<compile_context>
chip_gen: v7x
topology: tpu7x:2x2x1
jax: 0.10.0
libtpu: 0.0.40
codegen_flags: <defaults>
</compile_context>

<pallas_src>
import jax
import jax.numpy as jnp
from jax import lax
from jax.experimental import pallas as pl
from jax.experimental.pallas import tpu as pltpu

EPS = 1e-5
LANE = 128
MAX_TILE_B = 1024            # keeps the working set well under v5e's 16 MiB scoped VMEM


def _round_up(a, m):
    return (a + m - 1) // m * m


def _sigmoid(x):
    # Exact identity; one tanh EUP push instead of exp + precise divide.
    return 0.5 * jnp.tanh(0.5 * x) + 0.5


# ---------------------------------------------------------------------------
# Pallas kernel
# ---------------------------------------------------------------------------
def make_kernel(num_layers, pw):
    """pw: padded lane width of one fused (fwd|bwd) gate block / fc stage."""

    def kernel(*refs):
        x_ref = refs[0]
        lstm_w = refs[1:1 + num_layers]          # layer l: (in_rows_l, 3*pw) bf16
        fcw_ref = refs[1 + num_layers]           # (3, pw, pw) bf16: fc1, head1, head2
        bias_ref = refs[2 + num_layers]          # (1, num_layers*3*pw + 3*pw) f32
        out_ref = refs[3 + num_layers]           # (TILE_B, pw) f32

        # Bidirectional LSTM, seq_len == 1, h0 = c0 = 0.  BatchNorm1d(input) is
        # pre-folded into layer 0; the forget gate was removed host-side; both
        # directions share one matmul.  Matmuls run bf16 on the MXU with f32
        # accumulation; gate nonlinearities stay f32 (portable to v5e).
        # TODO(synk): on v6e/v7x the sigmoid/tanh block could run in bf16 for ~2x EUP.
        h = x_ref[...].astype(jnp.bfloat16)
        for l in range(num_layers):
            b = bias_ref[:, l * 3 * pw:(l + 1) * 3 * pw]
            gates = jnp.dot(h, lstm_w[l][...],
                            preferred_element_type=jnp.float32) + b
            i = _sigmoid(gates[:, 0 * pw:1 * pw])
            g = jnp.tanh(gates[:, 1 * pw:2 * pw])
            o = _sigmoid(gates[:, 2 * pw:3 * pw])
            # Padded lanes: bias 0 -> g = 0 -> i*g = 0 -> tanh = 0 -> h = 0 exactly,
            # so [h_fwd | h_bwd | exact zeros] is preserved (also exact in bf16).
            h = (o * jnp.tanh(i * g)).astype(jnp.bfloat16)

        boff = num_layers * 3 * pw

        # fc1 (bn1 folded in) + ReLU.  Dropout == identity in eval mode.
        out = jnp.dot(h, fcw_ref[0], preferred_element_type=jnp.float32)
        out = jnp.maximum(out + bias_ref[:, boff:boff + pw], 0.0)

        # Fused heads, stage 1: [fc_class | fc_reg] + ReLU.
        hid = jnp.dot(out.astype(jnp.bfloat16), fcw_ref[1],
                      preferred_element_type=jnp.float32)
        hid = jnp.maximum(hid + bias_ref[:, boff + pw:boff + 2 * pw], 0.0)

        # Fused heads, stage 2: block-diag [fc_classification, fc_regression].
        res = jnp.dot(hid.astype(jnp.bfloat16), fcw_ref[2],
                      preferred_element_type=jnp.float32)
        out_ref[...] = res + bias_ref[:, boff + 2 * pw:boff + 3 * pw]

    return kernel


# ---------------------------------------------------------------------------
# Synthetic parameters in "natural" (PyTorch-transposed) layout
# ---------------------------------------------------------------------------
def init_params(key, F, H, L, C):
    ks = iter(jax.random.split(key, 8 * L + 32))
    u = lambda k, shape, lo, hi: jax.random.uniform(k, shape, jnp.float32, lo, hi)
    p = {}
    p['bn_g'] = u(next(ks), (1, F), 0.5, 1.5)
    p['bn_b'] = u(next(ks), (1, F), -0.5, 0.5)
    p['bn_m'] = u(next(ks), (1, F), -0.5, 0.5)
    p['bn_v'] = u(next(ks), (1, F), 0.5, 1.5)

    s = float(H) ** -0.5
    lstm = []
    for l in range(L):
        in_dim = F if l == 0 else 2 * H
        layer = []
        for _direction in range(2):
            w_ih = u(next(ks), (in_dim, 4 * H), -s, s)                  # transposed W_ih
            b = u(next(ks), (1, 4 * H), -s, s) + u(next(ks), (1, 4 * H), -s, s)  # b_ih+b_hh
            layer += [w_ih, b]
        lstm.append(layer)
    p['lstm'] = lstm

    def lin(kw, kb, din, dout):
        sc = float(din) ** -0.5
        return (u(kw, (din, dout), -sc, sc), u(kb, (1, dout), -sc, sc))

    D = 2 * H
    p['fc1'] = lin(next(ks), next(ks), D, D // 2)
    p['bn1_g'] = u(next(ks), (1, D // 2), 0.5, 1.5)
    p['bn1_b'] = u(next(ks), (1, D // 2), -0.5, 0.5)
    p['bn1_m'] = u(next(ks), (1, D // 2), -0.5, 0.5)
    p['bn1_v'] = u(next(ks), (1, D // 2), 0.5, 1.5)
    p['fc_class'] = lin(next(ks), next(ks), D // 2, D // 4)
    p['fc_classification'] = lin(next(ks), next(ks), D // 4, C)
    p['fc_reg'] = lin(next(ks), next(ks), D // 2, D // 4)
    p['fc_regression'] = lin(next(ks), next(ks), D // 4, 1)
    return p


# ---------------------------------------------------------------------------
# Host-side operand packing (fusion + BN folding + lane padding + bf16 cast)
# ---------------------------------------------------------------------------
def build_operands(p, F, H, L, C):
    PW = _round_up(max(2 * H, C + 1), LANE)      # padded width of every stage
    D4 = (2 * H) // 4

    def pad2(a, rows, cols):
        z = jnp.zeros((rows, cols), jnp.float32)
        return z.at[:a.shape[0], :a.shape[1]].set(a)

    def fold_bn(g, b, m, v):
        s = g * lax.rsqrt(v + EPS)
        return s, b - m * s                      # y = x*s + t

    def fuse_dirs(wf, bf, wb, bb, rows):
        # Gate order in PyTorch weights: i, f, g, o.  Drop f (c0 == 0).
        wcols, bcols = [], []
        for gi in (0, 2, 3):
            wblk = jnp.concatenate([wf[:, gi * H:(gi + 1) * H],
                                    wb[:, gi * H:(gi + 1) * H]], axis=1)
            bblk = jnp.concatenate([bf[:, gi * H:(gi + 1) * H],
                                    bb[:, gi * H:(gi + 1) * H]], axis=1)
            wcols.append(pad2(wblk, rows, PW))
            bcols.append(pad2(bblk, 1, PW))
        return jnp.concatenate(wcols, axis=1), jnp.concatenate(bcols, axis=1)

    lstm_ws, lstm_bs = [], []
    for l in range(L):
        wf, bf, wb, bb = p['lstm'][l]
        rows = F if l == 0 else PW               # hidden layers see the padded h
        W, B = fuse_dirs(wf, bf, wb, bb, rows)
        if l == 0:
            # Fold eval-mode BatchNorm1d(input_size): x_n = x*s + t.
            s, t = fold_bn(p['bn_g'], p['bn_b'], p['bn_m'], p['bn_v'])   # (1, F)
            B = B + t @ W
            W = W * s.reshape(F, 1)
        lstm_ws.append(W)
        lstm_bs.append(B)

    # fc1 with bn1 folded: (x@w1 + b1 - m)*s + beta == x@(w1*s) + (b1*s + t).
    w1, b1 = p['fc1']
    s1, t1 = fold_bn(p['bn1_g'], p['bn1_b'], p['bn1_m'], p['bn1_v'])
    W_fc1 = pad2(w1 * s1, PW, PW)
    B_fc1 = pad2(b1 * s1 + t1, 1, PW)

    # Heads stage 1: [fc_class | fc_reg] fused.
    wc, bc = p['fc_class']
    wr, br = p['fc_reg']
    W_h1 = pad2(jnp.concatenate([wc, wr], axis=1), PW, PW)
    B_h1 = pad2(jnp.concatenate([bc, br], axis=1), 1, PW)

    # Heads stage 2: block-diag [fc_classification, fc_regression].
    wcc, bcc = p['fc_classification']
    wrr, brr = p['fc_regression']
    W_h2 = jnp.zeros((PW, PW), jnp.float32)
    W_h2 = W_h2.at[0:D4, 0:C].set(wcc)
    W_h2 = W_h2.at[D4:2 * D4, C:C + 1].set(wrr)
    B_h2 = jnp.zeros((1, PW), jnp.float32)
    B_h2 = B_h2.at[:, 0:C].set(bcc)
    B_h2 = B_h2.at[:, C:C + 1].set(brr)

    # bf16 matmul operands (MXU-native on all generations); biases stay f32.
    lstm_ws = [w.astype(jnp.bfloat16) for w in lstm_ws]
    fcw = jnp.stack([W_fc1, W_h1, W_h2]).astype(jnp.bfloat16)   # (3, PW, PW)
    bias = jnp.concatenate(lstm_bs + [B_fc1, B_h1, B_h2], axis=1)
    return lstm_ws, fcw, bias, PW


# ---------------------------------------------------------------------------
# Batch tiling: big 8-aligned tiles, minimal padding, >=2 (even) steps for v7x
# ---------------------------------------------------------------------------
def _choose_batch_tiling(B):
    b8 = _round_up(B, 8)
    min_steps = 2 if b8 >= 128 else 1            # keep both v7x TensorCores busy
    n_steps = max(min_steps, pl.cdiv(b8, MAX_TILE_B))
    if n_steps > 1 and n_steps % 2 == 1:
        n_steps += 1                             # even split across 2 cores
    tile = _round_up(pl.cdiv(b8, n_steps), 8)
    return tile, tile * n_steps


# ---------------------------------------------------------------------------
# Wrapper
# ---------------------------------------------------------------------------
def traffic_lstm_forward(x, params, num_layers, num_classes):
    assert x.ndim == 3 and x.shape[1] == 1, "kernel assumes seq_len == 1 (h0=c0=0 folding)"
    B, _, F = x.shape
    H = params['fc1'][0].shape[1]                # fc1: (2H, H)
    x2 = x.reshape(B, F).astype(jnp.float32)

    lstm_ws, fcw, bias, PW = build_operands(params, F, H, num_layers, num_classes)

    tile_b, b_pad = _choose_batch_tiling(B)
    if b_pad != B:
        x2 = jnp.pad(x2, ((0, b_pad - B), (0, 0)))

    const2 = lambda i: (0, 0)
    in_specs = [pl.BlockSpec((tile_b, F), lambda i: (i, 0))]
    in_specs += [pl.BlockSpec(w.shape, const2) for w in lstm_ws]
    in_specs += [pl.BlockSpec(fcw.shape, lambda i: (0, 0, 0)),
                 pl.BlockSpec(bias.shape, const2)]

    # Advisory cost estimate for the XLA scheduler.
    flops_row = 2 * (F * 3 * PW + (num_layers - 1) * PW * 3 * PW + 3 * PW * PW)
    transc_row = num_layers * 4 * PW             # 4 tanh per lane per layer
    weight_bytes = (sum(int(w.size) * w.dtype.itemsize for w in lstm_ws)
                    + int(fcw.size) * fcw.dtype.itemsize
                    + int(bias.size) * bias.dtype.itemsize)
    cost = pl.CostEstimate(
        flops=int(b_pad) * int(flops_row),
        transcendentals=int(b_pad) * int(transc_row),
        bytes_accessed=int(b_pad) * (F + PW) * 4 + weight_bytes)

    out = pl.pallas_call(
        make_kernel(num_layers, PW),
        out_shape=jax.ShapeDtypeStruct((b_pad, PW), jnp.float32),
        grid=(b_pad // tile_b,),
        in_specs=in_specs,
        out_specs=pl.BlockSpec((tile_b, PW), lambda i: (i, 0)),
        compiler_params=pltpu.CompilerParams(
            dimension_semantics=("parallel",),
            vmem_limit_bytes=32 * 1024 * 1024),
        cost_estimate=cost,
    )(x2, *lstm_ws, fcw, bias)

    class_out = out[:B, :num_classes]
    reg_out = out[:B, num_classes:num_classes + 1]
    return class_out, reg_out


# ---------------------------------------------------------------------------
# Pure-JAX reference (mirrors the PyTorch eval-mode forward, no folding)
# ---------------------------------------------------------------------------
def _ref_lstm_cell(inp, w, b):
    gates = inp @ w + b                          # h0 == 0 -> recurrent term is 0
    Hh = gates.shape[-1] // 4
    i = jax.nn.sigmoid(gates[:, 0:Hh])
    f = jax.nn.sigmoid(gates[:, Hh:2 * Hh])
    g = jnp.tanh(gates[:, 2 * Hh:3 * Hh])
    o = jax.nn.sigmoid(gates[:, 3 * Hh:4 * Hh])
    c = f * 0.0 + i * g                          # c0 == 0
    return o * jnp.tanh(c)


def reference_forward(x, p, L):
    B = x.shape[0]
    h = x.reshape(B, x.shape[-1]).astype(jnp.float32)
    h = (h - p['bn_m']) / jnp.sqrt(p['bn_v'] + EPS) * p['bn_g'] + p['bn_b']
    for l in range(L):
        wf, bf, wb, bb = p['lstm'][l]
        h = jnp.concatenate([_ref_lstm_cell(h, wf, bf),
                             _ref_lstm_cell(h, wb, bb)], axis=-1)
    w1, b1 = p['fc1']
    out = h @ w1 + b1
    out = (out - p['bn1_m']) / jnp.sqrt(p['bn1_v'] + EPS) * p['bn1_g'] + p['bn1_b']
    out = jnp.maximum(out, 0.0)
    wc, bc = p['fc_class']; wcc, bcc = p['fc_classification']
    wr, br = p['fc_reg']; wrr, brr = p['fc_regression']
    co = jnp.maximum(out @ wc + bc, 0.0) @ wcc + bcc
    ro = jnp.maximum(out @ wr + br, 0.0) @ wrr + brr
    return co, ro


if __name__ == "__main__":
    B, F, H, L, C = 4, 16, 32, 2, 5   # batch, input_size, hidden, num_layers, num_classes
    key = jax.random.PRNGKey(0)
    kx, kp = jax.random.split(key)
    x = jax.random.normal(kx, (B, 1, F), jnp.float32)   # (B, 1, input_size)
    params = init_params(kp, F, H, L, C)

    class_out, reg_out = traffic_lstm_forward(x, params, L, C)
    jax.block_until_ready((class_out, reg_out))

    ref_c, ref_r = reference_forward(x, params, L)
    assert class_out.shape == (B, C) and reg_out.shape == (B, 1)
    # bf16 MXU operands -> relaxed tolerance (per review), typical error ~1e-3.
    assert jnp.allclose(class_out, ref_c, atol=2e-2, rtol=2e-2)
    assert jnp.allclose(reg_out, ref_r, atol=2e-2, rtol=2e-2)
    print("KERNEL_OK")
</pallas_src>

<mosaic_0001>
module attributes {stable_mosaic.version = 11 : i64} {
  func.func @kernel(%arg0: i32, %arg1: memref<8x16xf32, #tpu.memory_space<vmem>>, %arg2: memref<16x384xbf16, #tpu.memory_space<vmem>>, %arg3: memref<128x384xbf16, #tpu.memory_space<vmem>>, %arg4: memref<3x128x128xbf16, #tpu.memory_space<vmem>>, %arg5: memref<1x1152xf32, #tpu.memory_space<vmem>>, %arg6: memref<8x128xf32, #tpu.memory_space<vmem>>) attributes {dimension_semantics = [#tpu.dimension_semantics<parallel>], iteration_bounds = array<i64: 1>, scalar_prefetch = 0 : i64, scratch_operands = 0 : i64, tpu.core_type = #tpu.core_type<tc>, window_params = [{transform_indices = @transform_0, window_bounds = array<i64: 8, 16>}, {pipeline_mode = #tpu.pipeline_mode<synchronous>, transform_indices = @transform_1, window_bounds = array<i64: 16, 384>}, {pipeline_mode = #tpu.pipeline_mode<synchronous>, transform_indices = @transform_2, window_bounds = array<i64: 128, 384>}, {pipeline_mode = #tpu.pipeline_mode<synchronous>, transform_indices = @transform_3, window_bounds = array<i64: 3, 128, 128>}, {pipeline_mode = #tpu.pipeline_mode<synchronous>, transform_indices = @transform_4, window_bounds = array<i64: 1, 1152>}, {transform_indices = @transform_5, window_bounds = array<i64: 8, 128>}]} {
    %c0 = arith.constant 0 : index
    %c0_0 = arith.constant 0 : index
    %0 = vector.load %arg1[%c0, %c0_0] : memref<8x16xf32, #tpu.memory_space<vmem>>, vector<8x16xf32>
    %1 = arith.truncf %0 : vector<8x16xf32> to vector<8x16xbf16>
    %c0_1 = arith.constant 0 : index
    %c0_2 = arith.constant 0 : index
    %2 = vector.load %arg5[%c0_1, %c0_2] : memref<1x1152xf32, #tpu.memory_space<vmem>>, vector<1x384xf32>
    %c0_3 = arith.constant 0 : index
    %c0_4 = arith.constant 0 : index
    %3 = vector.load %arg2[%c0_3, %c0_4] : memref<16x384xbf16, #tpu.memory_space<vmem>>, vector<16x384xbf16>
    %cst = arith.constant dense<0.000000e+00> : vector<8x384xf32>
    %4 = tpu.matmul %1, %3, %cst {dimension_numbers = #tpu.dot_dimension_numbers<[1], [0], [0], [1], [0, 0, 1, 1], [], []>} : vector<8x16xbf16>, vector<16x384xbf16>, vector<8x384xf32> -> vector<8x384xf32>
    %5 = vector.broadcast %2 : vector<1x384xf32> to vector<8x384xf32>
    %6 = arith.addf %4, %5 : vector<8x384xf32>
    %7 = vector.extract_strided_slice %6 {offsets = [0, 0], sizes = [8, 128], strides = [1, 1]} : vector<8x384xf32> to vector<8x128xf32>
    %cst_5 = arith.constant 5.000000e-01 : f32
    %8 = vector.broadcast %cst_5 : f32 to vector<8x128xf32>
    %9 = arith.mulf %8, %7 : vector<8x128xf32>
    %10 = math.tanh %9 : vector<8x128xf32>
    %cst_6 = arith.constant 5.000000e-01 : f32
    %11 = vector.broadcast %cst_6 : f32 to vector<8x128xf32>
    %12 = arith.mulf %11, %10 : vector<8x128xf32>
    %cst_7 = arith.constant 5.000000e-01 : f32
    %13 = vector.broadcast %cst_7 : f32 to vector<8x128xf32>
    %14 = arith.addf %12, %13 : vector<8x128xf32>
    %15 = vector.extract_strided_slice %6 {offsets = [0, 128], sizes = [8, 128], strides = [1, 1]} : vector<8x384xf32> to vector<8x128xf32>
    %16 = math.tanh %15 : vector<8x128xf32>
    %17 = vector.extract_strided_slice %6 {offsets = [0, 256], sizes = [8, 128], strides = [1, 1]} : vector<8x384xf32> to vector<8x128xf32>
    %cst_8 = arith.constant 5.000000e-01 : f32
    %18 = vector.broadcast %cst_8 : f32 to vector<8x128xf32>
    %19 = arith.mulf %18, %17 : vector<8x128xf32>
    %20 = math.tanh %19 : vector<8x128xf32>
    %cst_9 = arith.constant 5.000000e-01 : f32
    %21 = vector.broadcast %cst_9 : f32 to vector<8x128xf32>
    %22 = arith.mulf %21, %20 : vector<8x128xf32>
    %cst_10 = arith.constant 5.000000e-01 : f32
    %23 = vector.broadcast %cst_10 : f32 to vector<8x128xf32>
    %24 = arith.addf %22, %23 : vector<8x128xf32>
    %25 = arith.mulf %14, %16 : vector<8x128xf32>
    %26 = math.tanh %25 : vector<8x128xf32>
    %27 = arith.mulf %24, %26 : vector<8x128xf32>
    %28 = arith.truncf %27 : vector<8x128xf32> to vector<8x128xbf16>
    %c0_11 = arith.constant 0 : index
    %c384 = arith.constant 384 : index
    %29 = vector.load %arg5[%c0_11, %c384] : memref<1x1152xf32, #tpu.memory_space<vmem>>, vector<1x384xf32>
    %c0_12 = arith.constant 0 : index
    %c0_13 = arith.constant 0 : index
    %30 = vector.load %arg3[%c0_12, %c0_13] : memref<128x384xbf16, #tpu.memory_space<vmem>>, vector<128x384xbf16>
    %cst_14 = arith.constant dense<0.000000e+00> : vector<8x384xf32>
    %31 = tpu.matmul %28, %30, %cst_14 {dimension_numbers = #tpu.dot_dimension_numbers<[1], [0], [0], [1], [0, 0, 1, 1], [], []>} : vector<8x128xbf16>, vector<128x384xbf16>, vector<8x384xf32> -> vector<8x384xf32>
    %32 = vector.broadcast %29 : vector<1x384xf32> to vector<8x384xf32>
    %33 = arith.addf %31, %32 : vector<8x384xf32>
    %34 = vector.extract_strided_slice %33 {offsets = [0, 0], sizes = [8, 128], strides = [1, 1]} : vector<8x384xf32> to vector<8x128xf32>
    %cst_15 = arith.constant 5.000000e-01 : f32
    %35 = vector.broadcast %cst_15 : f32 to vector<8x128xf32>
    %36 = arith.mulf %35, %34 : vector<8x128xf32>
    %37 = math.tanh %36 : vector<8x128xf32>
    %cst_16 = arith.constant 5.000000e-01 : f32
    %38 = vector.broadcast %cst_16 : f32 to vector<8x128xf32>
    %39 = arith.mulf %38, %37 : vector<8x128xf32>
    %cst_17 = arith.constant 5.000000e-01 : f32
    %40 = vector.broadcast %cst_17 : f32 to vector<8x128xf32>
    %41 = arith.addf %39, %40 : vector<8x128xf32>
    %42 = vector.extract_strided_slice %33 {offsets = [0, 128], sizes = [8, 128], strides = [1, 1]} : vector<8x384xf32> to vector<8x128xf32>
    %43 = math.tanh %42 : vector<8x128xf32>
    %44 = vector.extract_strided_slice %33 {offsets = [0, 256], sizes = [8, 128], strides = [1, 1]} : vector<8x384xf32> to vector<8x128xf32>
    %cst_18 = arith.constant 5.000000e-01 : f32
    %45 = vector.broadcast %cst_18 : f32 to vector<8x128xf32>
    %46 = arith.mulf %45, %44 : vector<8x128xf32>
    %47 = math.tanh %46 : vector<8x128xf32>
    %cst_19 = arith.constant 5.000000e-01 : f32
    %48 = vector.broadcast %cst_19 : f32 to vector<8x128xf32>
    %49 = arith.mulf %48, %47 : vector<8x128xf32>
    %cst_20 = arith.constant 5.000000e-01 : f32
    %50 = vector.broadcast %cst_20 : f32 to vector<8x128xf32>
    %51 = arith.addf %49, %50 : vector<8x128xf32>
    %52 = arith.mulf %41, %43 : vector<8x128xf32>
    %53 = math.tanh %52 : vector<8x128xf32>
    %54 = arith.mulf %51, %53 : vector<8x128xf32>
    %55 = arith.truncf %54 : vector<8x128xf32> to vector<8x128xbf16>
    %c0_21 = arith.constant 0 : index
    %c0_22 = arith.constant 0 : index
    %c0_23 = arith.constant 0 : index
    %56 = vector.load %arg4[%c0_21, %c0_22, %c0_23] : memref<3x128x128xbf16, #tpu.memory_space<vmem>>, vector<1x128x128xbf16>
    %57 = vector.shape_cast %56 : vector<1x128x128xbf16> to vector<128x128xbf16>
    %cst_24 = arith.constant dense<0.000000e+00> : vector<8x128xf32>
    %58 = tpu.matmul %55, %57, %cst_24 {dimension_numbers = #tpu.dot_dimension_numbers<[1], [0], [0], [1], [0, 0, 1, 1], [], []>} : vector<8x128xbf16>, vector<128x128xbf16>, vector<8x128xf32> -> vector<8x128xf32>
    %c0_25 = arith.constant 0 : index
    %c768 = arith.constant 768 : index
    %59 = vector.load %arg5[%c0_25, %c768] : memref<1x1152xf32, #tpu.memory_space<vmem>>, vector<1x128xf32>
    %60 = vector.broadcast %59 : vector<1x128xf32> to vector<8x128xf32>
    %61 = arith.addf %58, %60 : vector<8x128xf32>
    %cst_26 = arith.constant 0.000000e+00 : f32
    %62 = vector.broadcast %cst_26 : f32 to vector<8x128xf32>
    %63 = arith.maximumf %61, %62 : vector<8x128xf32>
    %64 = arith.truncf %63 : vector<8x128xf32> to vector<8x128xbf16>
    %c1 = arith.constant 1 : index
    %c0_27 = arith.constant 0 : index
    %c0_28 = arith.constant 0 : index
    %65 = vector.load %arg4[%c1, %c0_27, %c0_28] : memref<3x128x128xbf16, #tpu.memory_space<vmem>>, vector<1x128x128xbf16>
    %66 = vector.shape_cast %65 : vector<1x128x128xbf16> to vector<128x128xbf16>
    %cst_29 = arith.constant dense<0.000000e+00> : vector<8x128xf32>
    %67 = tpu.matmul %64, %66, %cst_29 {dimension_numbers = #tpu.dot_dimension_numbers<[1], [0], [0], [1], [0, 0, 1, 1], [], []>} : vector<8x128xbf16>, vector<128x128xbf16>, vector<8x128xf32> -> vector<8x128xf32>
    %c0_30 = arith.constant 0 : index
    %c896 = arith.constant 896 : index
    %68 = vector.load %arg5[%c0_30, %c896] : memref<1x1152xf32, #tpu.memory_space<vmem>>, vector<1x128xf32>
    %69 = vector.broadcast %68 : vector<1x128xf32> to vector<8x128xf32>
    %70 = arith.addf %67, %69 : vector<8x128xf32>
    %cst_31 = arith.constant 0.000000e+00 : f32
    %71 = vector.broadcast %cst_31 : f32 to vector<8x128xf32>
    %72 = arith.maximumf %70, %71 : vector<8x128xf32>
    %73 = arith.truncf %72 : vector<8x128xf32> to vector<8x128xbf16>
    %c2 = arith.constant 2 : index
    %c0_32 = arith.constant 0 : index
    %c0_33 = arith.constant 0 : index
    %74 = vector.load %arg4[%c2, %c0_32, %c0_33] : memref<3x128x128xbf16, #tpu.memory_space<vmem>>, vector<1x128x128xbf16>
    %75 = vector.shape_cast %74 : vector<1x128x128xbf16> to vector<128x128xbf16>
    %cst_34 = arith.constant dense<0.000000e+00> : vector<8x128xf32>
    %76 = tpu.matmul %73, %75, %cst_34 {dimension_numbers = #tpu.dot_dimension_numbers<[1], [0], [0], [1], [0, 0, 1, 1], [], []>} : vector<8x128xbf16>, vector<128x128xbf16>, vector<8x128xf32> -> vector<8x128xf32>
    %c0_35 = arith.constant 0 : index
    %c1024 = arith.constant 1024 : index
    %77 = vector.load %arg5[%c0_35, %c1024] : memref<1x1152xf32, #tpu.memory_space<vmem>>, vector<1x128xf32>
    %78 = vector.broadcast %77 : vector<1x128xf32> to vector<8x128xf32>
    %79 = arith.addf %76, %78 : vector<8x128xf32>
    %c0_36 = arith.constant 0 : index
    %c0_37 = arith.constant 0 : index
    %80 = vector.load %arg6[%c0_36, %c0_37] : memref<8x128xf32, #tpu.memory_space<vmem>>, vector<8x128xf32>
    tpu.vector_store %arg6[%c0_36, %c0_37], %79 {strides = array<i32>} : memref<8x128xf32, #tpu.memory_space<vmem>>, vector<8x128xf32>,
    return
  }
  func.func @transform_0(%arg0: i32) -> (i32, i32) {
    %c0_i32 = arith.constant 0 : i32
    %c0_i32_0 = arith.constant 0 : i32
    return %arg0, %c0_i32 : i32, i32
  }
  func.func @transform_1(%arg0: i32) -> (i32, i32) {
    %c0_i32 = arith.constant 0 : i32
    %c0_i32_0 = arith.constant 0 : i32
    %c0_i32_1 = arith.constant 0 : i32
    return %c0_i32, %c0_i32_0 : i32, i32
  }
  func.func @transform_2(%arg0: i32) -> (i32, i32) {
    %c0_i32 = arith.constant 0 : i32
    %c0_i32_0 = arith.constant 0 : i32
    %c0_i32_1 = arith.constant 0 : i32
    return %c0_i32, %c0_i32_0 : i32, i32
  }
  func.func @transform_3(%arg0: i32) -> (i32, i32, i32) {
    %c0_i32 = arith.constant 0 : i32
    %c0_i32_0 = arith.constant 0 : i32
    %c0_i32_1 = arith.constant 0 : i32
    %c0_i32_2 = arith.constant 0 : i32
    return %c0_i32, %c0_i32_0, %c0_i32_1 : i32, i32, i32
  }
  func.func @transform_4(%arg0: i32) -> (i32, i32) {
    %c0_i32 = arith.constant 0 : i32
    %c0_i32_0 = arith.constant 0 : i32
    %c0_i32_1 = arith.constant 0 : i32
    return %c0_i32, %c0_i32_0 : i32, i32
  }
  func.func @transform_5(%arg0: i32) -> (i32, i32) {
    %c0_i32 = arith.constant 0 : i32
    %c0_i32_0 = arith.constant 0 : i32
    return %arg0, %c0_i32 : i32, i32
  }
}

</mosaic_0001>

<bundles_post_ra>
// kernel: tpu_custom_call.1
= control target key start
LH: loop header
LB: loop body
LE: loop exit
PB: predicated region body
PF: predicated region fallthrough
CT: control target
= control target key end

     0   :  { %10 = vsyncpa [#allocation3], 0  ;;  %s1409_s0 = inlined_call_operand.hbm [shape: f32[8,16], index: 0, kind: input, shape index: {}]   ;;  %s1410_s1 = inlined_call_operand.hbm [shape: bf16[16,384], index: 1, kind: input, shape index: {}]   ;;  %s1411_s2 = inlined_call_operand.hbm [shape: bf16[128,384], index: 2, kind: input, shape index: {}]   ;;  %s1412_s3 = inlined_call_operand.hbm [shape: bf16[3,128,128], index: 3, kind: input, shape index: {}]   ;;  %s1413_s4 = inlined_call_operand.vmem [shape: f32[1,1152], index: 4, kind: input, shape index: {}]   ;;  %s1414_s5 = inlined_call_operand.hbm [shape: f32[8,128], index: 5, kind: output, shape index: {}]  }
   0x1   :  { %11 = vsyncpa [#allocation6], 0 }
   0x2   :  { %12 = vsyncpa [#allocation9], 0 }
   0x3   :  { %13 = vsyncpa [#allocation4], 0  ;;  %s1226_s18 = smov [#allocation5]   ;;  %s1108_s22 = scalar_lea.hbm %s1410_s1, 384 }
   0x4   :  { %s29_s19 = sshll.u32 %s1226_s18, 4  ;;  %p1109_p0 = scmp.ne.s32.totalorder %s1410_s1, %s1108_s22  ;;  %s30_s19 = int_to_ptr.vmem [resolvable:$true] %s29_s19 }
   0x5   :  { %p1112_p1 = scmp.lt.u32.totalorder %s1108_s22, %s1410_s1 }
   0x7   :  { %p1114_p2 = pnand %p1112_p1, %p1109_p0 }
   0x9   :  { %1117 = shalt.err (!%p1114_p2)
}
   0xa   :  { %s1118_s27 = scalar_lea.vmem %s30_s19, 384  ;;  %p1123_p4 = scmp.lt.s32.totalorder %s30_s19, %s30_s19 }
   0xb   :  { %p1119_p3 = scmp.ne.s32.totalorder %s30_s19, %s1118_s27  ;;  %p1124_p5 = scmp.lt.s32.totalorder %s1118_s27, %s1118_s27 }
   0xd   :  { %p1125_p6 = por %p1124_p5, %p1123_p4 }
   0xf   :  { %p1126_p7 = pnand %p1125_p6, %p1119_p3 }
  0x11   :  { %1129 = shalt.err (!%p1126_p7)
}
  0x12   :  { %s1227_s28 = smov 192   ;;  %s1228_s29 = smov 12  }
  0x13   :  { %35 = dma.hbm_to_vmem [thread:$0]  %s1410_s1, 384, %s30_s19, [#allocation6], %s1227_s28, %s1227_s28, %s1228_s29  }
  0x14   :  { %s1229_s7 = smov [#allocation2]   ;;  %s1230_s9 = smov [#allocation7]  }
  0x15   :  { %s20_s8 = sshll.u32 %s1229_s7, 4  ;;  %s41_s10 = sshll.u32 %s1230_s9, 4  ;;  %s21_s8 = int_to_ptr.vmem [resolvable:$true] %s20_s8  ;;  %s42_s10 = int_to_ptr.vmem [resolvable:$true] %s41_s10 }
  0x16   :  { %s1130_s13 = scalar_lea.hbm %s1409_s0, 128 }
  0x17   :  { %p1131_p8 = scmp.ne.s32.totalorder %s1409_s0, %s1130_s13  ;;  %p1134_p9 = scmp.lt.u32.totalorder %s1130_s13, %s1409_s0 }
  0x19   :  { %p1136_p10 = pnand %p1134_p9, %p1131_p8 }
  0x1b   :  { %1139 = shalt.err (!%p1136_p10)
}
  0x1c   :  { %s1140_s1 = scalar_lea.vmem %s21_s8, 128  ;;  %p1145_p12 = scmp.lt.s32.totalorder %s21_s8, %s21_s8 }
  0x1d   :  { %p1141_p11 = scmp.ne.s32.totalorder %s21_s8, %s1140_s1  ;;  %p1146_p13 = scmp.lt.s32.totalorder %s1140_s1, %s1140_s1 }
  0x1f   :  { %p1147_p0 = por %p1146_p13, %p1145_p12 }
  0x21   :  { %p1148_p1 = pnand %p1147_p0, %p1141_p11 }
  0x23   :  { %1151 = shalt.err (!%p1148_p1)
}
  0x24   :  { %23 = dma.hbm_to_vmem [thread:$0]  %s1409_s0, 128, %s21_s8, [#allocation3]  }
  0x25   :  { %s1152_s22 = scalar_lea.hbm %s1411_s2, 3072 }
  0x26   :  { %p1153_p2 = scmp.ne.s32.totalorder %s1411_s2, %s1152_s22  ;;  %p1156_p3 = scmp.lt.u32.totalorder %s1152_s22, %s1411_s2 }
  0x28   :  { %p1158_p4 = pnand %p1156_p3, %p1153_p2 }
  0x2a   :  { %1161 = shalt.err (!%p1158_p4)
}
  0x2b   :  { %s1162_s27 = scalar_lea.vmem %s42_s10, 3072  ;;  %p1167_p6 = scmp.lt.s32.totalorder %s42_s10, %s42_s10 }
  0x2c   :  { %p1163_p5 = scmp.ne.s32.totalorder %s42_s10, %s1162_s27  ;;  %p1168_p7 = scmp.lt.s32.totalorder %s1162_s27, %s1162_s27 }
  0x2e   :  { %p1169_p8 = por %p1168_p7, %p1167_p6 }
  0x30   :  { %p1170_p9 = pnand %p1169_p8, %p1163_p5 }
  0x32   :  { %1173 = shalt.err (!%p1170_p9)
}
  0x33   :  { %47 = dma.hbm_to_vmem [thread:$0]  %s1411_s2, 3072, %s42_s10, [#allocation6], %s1227_s28, %s1227_s28, %s1228_s29  }
  0x34   :  { %s1231_s6 = smov [#allocation8]   ;;  %s1174_s11 = scalar_lea.hbm %s1412_s3, 3072 }
  0x35   :  { %s53_s7 = sshll.u32 %s1231_s6, 4  ;;  %p1175_p10 = scmp.ne.s32.totalorder %s1412_s3, %s1174_s11  ;;  %s54_s7 = int_to_ptr.vmem [resolvable:$true] %s53_s7 }
  0x36   :  { %p1178_p11 = scmp.lt.u32.totalorder %s1174_s11, %s1412_s3 }
  0x38   :  { %p1180_p12 = pnand %p1178_p11, %p1175_p10 }
  0x3a   :  { %1183 = shalt.err (!%p1180_p12)
}
  0x3b   :  { %s1184_s16 = scalar_lea.vmem %s54_s7, 3072  ;;  %p1189_p0 = scmp.lt.s32.totalorder %s54_s7, %s54_s7 }
  0x3c   :  { %p1185_p13 = scmp.ne.s32.totalorder %s54_s7, %s1184_s16  ;;  %p1190_p1 = scmp.lt.s32.totalorder %s1184_s16, %s1184_s16 }
  0x3e   :  { %p1191_p2 = por %p1190_p1, %p1189_p0 }
  0x40   :  { %p1192_p3 = pnand %p1191_p2, %p1185_p13 }
  0x42   :  { %1195 = shalt.err (!%p1192_p3)
}
  0x43   :  { %s1232_s2 = smov 64   ;;  %s1233_s28 = smov 4  }
  0x44   :  { %59 = dma.hbm_to_vmem [thread:$0]  %s1412_s3, 3072, %s54_s7, [#allocation9], %s1232_s2, %s1232_s2, %s1233_s28  }
  0x45   :  { %1218 = dma.done.wait [#allocation3], 128  }
  0x46   :  { %1219 = vsyncadd [#allocation3], 4294967168 }
  0x47   :  { %1220 = dma.done.wait [#allocation6], 3456  }
  0x48   :  { %1221 = vsyncadd [#allocation6], 4294963840 }
  0x49   :  { %1222 = dma.done.wait [#allocation9], 3072  }
  0x4a   :  { %1223 = vsyncadd [#allocation9], 4294964224  ;;  %v1234_v0 = vmov 0   ;;  %v1032_v1 = vld [vmem:[#allocation5 + $0x4] ss:$12 sps:$4 sm:$0xff]   ;;  %v75_v3 = vld [vmem:[#allocation2] sm:$0xff]  ;;  %v83_v31 = vlaneseq }
  0x4b   :  { %150 = vmatprep.mubr.bf16.mxu1 %v1234_v0  ;;  %421 = vmatprep.mubr.bf16.mxu0 %v1234_v0  ;;  %v1034_v2 = vld [vmem:[#allocation5] ss:$12 sps:$4 sm:$0xff]   ;;  %v76_v4 = vpack.c.bf16 %v75_v3, %v75_v3  ;;  %v1035_v5 = vld [vmem:[#allocation5 + $0x8] ss:$12 sps:$4 sm:$0xff]   ;;  %vm114_vm0 = vcmask 130048   ;;  %v1235_v6 = vmov 0.0  }
  0x4c   :  { %118 = vmatprep.subr.bf16.mxu1 %v1032_v1  ;;  %vm1236_vm1 = vmmov 0   ;;  %v1036_v7 = vld [vmem:[#allocation7 + $0x4] ss:$12 sps:$4 sm:$0xff]   ;;  %v1038_v8 = vld [vmem:[#allocation7] ss:$12 sps:$4 sm:$0xff]   ;;  %v1337_v32 = vshrl.u32 %v83_v31, 7 }
  0x4d   :  { %119 = vmatpush1.bf16.msra.mxu1 %v1034_v2  ;;  %v1039_v9 = vld [vmem:[#allocation7 + $0x8] ss:$12 sps:$4 sm:$0xff]   ;;  %389 = vmatprep.subr.bf16.mxu0 %v1036_v7  ;;  %v1042_v11 = vld [vmem:[#allocation7 + $0x18] ss:$12 sps:$4 sm:$0xff]   ;;  %v1043_v12 = vld [vmem:[#allocation7 + $0x20] ss:$12 sps:$4 sm:$0xff]  }
  0x4e   :  { %934 = vmatprep.subr.bf16.mxu1 %v1235_v6  ;;  %390 = vmatpush1.bf16.msra.mxu0 %v1038_v8  ;;  %v1040_v10 = vld [vmem:[#allocation7 + $0x1c] ss:$12 sps:$4 sm:$0xff]   ;;  %v1044_v13 = vld [vmem:[#allocation7 + $0x34] ss:$12 sps:$4 sm:$0xff]   ;;  %v1047_v15 = vld [vmem:[#allocation7 + $0x38] ss:$12 sps:$4 sm:$0xff]  }
  0x4f   :  { %391 = vmatprep.subr.bf16.mxu0 %v1040_v10  ;;  %v1046_v14 = vld [vmem:[#allocation7 + $0x30] ss:$12 sps:$4 sm:$0xff]   ;;  %v1048_v16 = vld [vmem:[#allocation7 + $0x4c] ss:$12 sps:$4 sm:$0xff]   ;;  %v1050_v17 = vld [vmem:[#allocation7 + $0x48] ss:$12 sps:$4 sm:$0xff]  }
  0x50   :  { %843 = vmatmul.mubr.msk.bf16.vlgmr.msra.gmra.mrb[0].mxu1 %vm114_vm0, %v76_v4  ;;  %v1051_v18 = vld [vmem:[#allocation7 + $0x50] ss:$12 sps:$4 sm:$0xff]   ;;  %v1054_v20 = vld [vmem:[#allocation7 + $0x60] ss:$12 sps:$4 sm:$0xff]   ;;  %v1055_v21 = vld [vmem:[#allocation7 + $0x68] ss:$12 sps:$4 sm:$0xff]  }
  0x51   :  { %935 = vmatpush3.bf16.msra.mxu1 %v1035_v5  ;;  %936 = vmatprep.mubr.msk.bf16.mxu1 %vm1236_vm1, %v1235_v6  ;;  %v1052_v19 = vld [vmem:[#allocation7 + $0x64] ss:$12 sps:$4 sm:$0xff]   ;;  %v1056_v22 = vld [vmem:[#allocation7 + $0x7c] ss:$12 sps:$4 sm:$0xff]   ;;  %v1059_v24 = vld [vmem:[#allocation7 + $0x80] ss:$12 sps:$4 sm:$0xff]  }
  0x52   :  { %940 = vmatprep.subr.bf16.mxu1 %v1235_v6  ;;  %392 = vmatpush1.bf16.msra.mxu0 %v1042_v11  ;;  %v1058_v23 = vld [vmem:[#allocation7 + $0x78] ss:$12 sps:$4 sm:$0xff]   ;;  %v1060_v25 = vld [vmem:[#allocation7 + $0x94] ss:$12 sps:$4 sm:$0xff]   ;;  %v1062_v26 = vld [vmem:[#allocation7 + $0x90] ss:$12 sps:$4 sm:$0xff]  }
  0x53   :  { %393 = vmatprep.subr.bf16.mxu0 %v1044_v13  ;;  %v1063_v27 = vld [vmem:[#allocation7 + $0x98] ss:$12 sps:$4 sm:$0xff]   ;;  %v1066_v29 = vld [vmem:[#allocation7 + $0xa8] ss:$12 sps:$4 sm:$0xff]   ;;  %v1067_v30 = vld [vmem:[#allocation7 + $0xb0] ss:$12 sps:$4 sm:$0xff]  }
  0x54   :  { %v1064_v28 = vld [vmem:[#allocation7 + $0xac] ss:$12 sps:$4 sm:$0xff]   ;;  %v85_v33 = vsub.s32 0, %v1337_v32  ;;  %v77_v34 = vld [vmem:[%s1413_s4] sm:$0x7]  ;;  %v89_v36 = vsub.s32 1, %v1337_v32 }
  0x55   :  { %v93_v41 = vsub.s32 2, %v1337_v32  ;;  %v1068_v0 = vld [vmem:[#allocation8] sm:$0xff]   ;;  %v1069_v1 = vld [vmem:[#allocation8 + $0x8] sm:$0xff]   ;;  %v1070_v2 = vld [vmem:[#allocation8 + $0x10] sm:$0xff]   ;;  %s1237_s25 = smov [#allocation10]  }
  0x56   :  { %394 = vmatpush1.bf16.msra.mxu0 %v1046_v14  ;;  %v86_v35 = vrot.slane %v77_v34, %v85_v33  ;;  %v90_v39 = vrot.slane %v77_v34, %v89_v36  ;;  %v1071_v3 = vld [vmem:[#allocation8 + $0x18] sm:$0xff]   ;;  %v1073_v5 = vld [vmem:[#allocation8 + $0x28] sm:$0xff]   ;;  %v1074_v7 = vld [vmem:[#allocation8 + $0x30] sm:$0xff]   ;;  %s829_s26 = sshll.u32 %s1237_s25, 4  ;;  %s830_s26 = int_to_ptr.vmem [resolvable:$true] %s829_s26 }
  0x57   :  { %395 = vmatprep.subr.bf16.mxu0 %v1048_v16  ;;  %v94_v46 = vrot.slane %v77_v34, %v93_v41  ;;  %v1075_v8 = vld [vmem:[#allocation8 + $0x38] sm:$0xff]   ;;  %v1077_v10 = vld [vmem:[#allocation8 + $0x48] sm:$0xff]   ;;  %v1078_v11 = vld [vmem:[#allocation8 + $0x50] sm:$0xff]   ;;  %s1196_s27 = scalar_lea.vmem %s830_s26, 128  ;;  %p1201_p5 = scmp.lt.s32.totalorder %s830_s26, %s830_s26 }
  0x58   :  { %937 = vmatmul.mubr.msk.bf16.vlgmr.msra.gmra.mrb[4].mxu1 %vm114_vm0, %v76_v4  ;;  %v1072_v4 = vld [vmem:[#allocation8 + $0x20] sm:$0xff]   ;;  %v1081_v14 = vld [vmem:[#allocation8 + $0x68] sm:$0xff]   ;;  %p1197_p4 = scmp.ne.s32.totalorder %s830_s26, %s1196_s27  ;;  %p1202_p6 = scmp.lt.s32.totalorder %s1196_s27, %s1196_s27 }
  0x59   :  { %956 = vmatprep.mubr.msk.bf16.mxu1 %vm1236_vm1, %v1235_v6  ;;  %941 = vmatpush3.bf16.msra.mxu1 %v1039_v9  ;;  %v1076_v9 = vld [vmem:[#allocation8 + $0x40] sm:$0xff]  }
  0x5a   :  { %942 = vmatprep.subr.bf16.mxu1 %v1235_v6  ;;  %396 = vmatpush1.bf16.msra.mxu0 %v1050_v17  ;;  %v1080_v13 = vld [vmem:[#allocation8 + $0x60] sm:$0xff]   ;;  %p1203_p7 = por %p1202_p6, %p1201_p5 }
  0x5b   :  { %397 = vmatprep.subr.bf16.mxu0 %v1052_v19 }
  0x5c   :  { %p1204_p8 = pnand %p1203_p7, %p1197_p4 }
  0x5d   :  { %943 = vmatpush3.bf16.msra.mxu1 %v1043_v12  ;;  %v1079_v12 = vld [vmem:[#allocation8 + $0x58] sm:$0xff]  }
  0x5e   :  { %944 = vmatprep.subr.bf16.mxu1 %v1235_v6  ;;  %398 = vmatpush1.bf16.msra.mxu0 %v1054_v20 }
  0x5f   :  { %399 = vmatprep.subr.bf16.mxu0 %v1056_v22 }
  0x61   :  { %945 = vmatpush3.bf16.msra.mxu1 %v1047_v15  ;;  %v212_v15 = vld [vmem:[%s1413_s4 + $0x3] sm:$0x7] }
  0x62   :  { %946 = vmatprep.subr.bf16.mxu1 %v1235_v6  ;;  %400 = vmatpush1.bf16.msra.mxu0 %v1058_v23  ;;  %v249_v16 = vrot.slane %v212_v15, %v85_v33  ;;  %v253_v20 = vrot.slane %v212_v15, %v89_v36  ;;  %v257_v23 = vrot.slane %v212_v15, %v93_v41 }
  0x63   :  { %401 = vmatprep.subr.bf16.mxu0 %v1060_v25 }
  0x65   :  { %947 = vmatpush3.bf16.msra.mxu1 %v1051_v18 }
  0x66   :  { %948 = vmatprep.subr.bf16.mxu1 %v1235_v6  ;;  %402 = vmatpush1.bf16.msra.mxu0 %v1062_v26 }
  0x67   :  { %403 = vmatprep.subr.bf16.mxu0 %v1064_v28 }
  0x69   :  { %949 = vmatpush3.bf16.msra.mxu1 %v1055_v21 }
  0x6a   :  { %950 = vmatprep.subr.bf16.mxu1 %v1235_v6  ;;  %404 = vmatpush1.bf16.msra.mxu0 %v1066_v29 }
  0x6b   :  { %960 = vmatprep.subr.bf16.mxu0 %v1235_v6 }
  0x6d   :  { %951 = vmatpush3.bf16.msra.mxu1 %v1059_v24 }
  0x6e   :  { %952 = vmatprep.subr.bf16.mxu1 %v1235_v6 }
  0x71   :  { %953 = vmatpush3.bf16.msra.mxu1 %v1063_v27 }
  0x72   :  { %954 = vmatprep.subr.bf16.mxu1 %v1235_v6 }
  0x75   :  { %955 = vmatpush3.bf16.msra.mxu1 %v1067_v30 }
  0x76   :  { %980 = vmatprep.subr.bf16.mxu1 %v1235_v6 }
 0x123   :  { %v152_v37 = vpop.f32.mrb[0].mxu1 }
 0x124   :  { %v153_v38 = vadd.f32 %v152_v37, %v86_v35  ;;  %v154_v40 = vpop.f32.mrb[1].mxu1 }
 0x125   :  { %v156_v42 = vpop.f32.mrb[2].mxu1  ;;  %v155_v45 = vadd.f32 %v154_v40, %v90_v39 }
 0x126   :  { %v199_v43 = vmul.f32 0.5, %v153_v38  ;;  %v157_v44 = vpop.f32.mrb[3].mxu1 }
 0x127   :  { %v1083_v44 = vld [vmem:[#allocation8 + $0x78] sm:$0xff]  }
 0x128   :  { %1092 = vtanh.f32 %v199_v43  ;;  %v1082_v43 = vld [vmem:[#allocation8 + $0x70] sm:$0xff]  }
 0x129   :  { %1094 = vtanh.f32 %v155_v45  ;;  %v1084_v45 = vld [vmem:[#allocation8 + $0x80] sm:$0xff]  }
 0x12b   :  { %v193_v47 = vpop.f32.mrb[4].mxu1 }
 0x12c   :  { %v194_v48 = vadd.f32 %v193_v47, %v94_v46  ;;  %v938_v49 = vpop.f32.mrb[5].mxu1  ;;  %v1085_v46 = vld [vmem:[#allocation8 + $0x88] sm:$0xff]   ;;  %v1086_v47 = vld [vmem:[#allocation8 + $0x90] sm:$0xff]  }
 0x12d   :  { %v196_v50 = vpop.f32.mrb[6].mxu1  ;;  %v1088_v49 = vld [vmem:[#allocation8 + $0xa0] sm:$0xff]  }
 0x12e   :  { %v204_v51 = vmul.f32 0.5, %v194_v48  ;;  %v939_v52 = vpop.f32.mrb[7].mxu1  ;;  %v1087_v48 = vld [vmem:[#allocation8 + $0x98] sm:$0xff]   ;;  %v1089_v50 = vld [vmem:[#allocation8 + $0xa8] sm:$0xff]  }
 0x130   :  { %1096 = vtanh.f32 %v204_v51  ;;  %v869_v51 = vld [vmem:[%s1413_s4 + $0x6] ss:$0 sm:$0xff] }
 0x132   :  { %v1093_v53 = vpop.eup %1092 }
 0x133   :  { %v201_v54 = vmul.f32 0.5, %v1093_v53  ;;  %v1095_v56 = vpop.eup %1094 }
 0x135   :  { %v202_v55 = vadd.f32 0.5, %v201_v54 }
 0x137   :  { %v208_v57 = vmul.f32 %v1095_v56, %v202_v55 }
 0x139   :  { %1098 = vtanh.f32 %v208_v57 }
 0x13a   :  { %v1097_v58 = vpop.eup %1096 }
 0x13b   :  { %v206_v59 = vmul.f32 0.5, %v1097_v58 }
 0x13d   :  { %v207_v60 = vadd.f32 0.5, %v206_v59  ;;  %v1090_v59 = vld [vmem:[#allocation8 + $0xb0] sm:$0xff]  }
 0x143   :  { %v1099_v61 = vpop.eup %1098 }
 0x144   :  { %v210_v62 = vmul.f32 %v1099_v61, %v207_v60  ;;  %v1091_v60 = vld [vmem:[#allocation8 + $0xb8] sm:$0xff]   ;;  %v878_v61 = vld [vmem:[%s1413_s4 + $0x7] ss:$0 sm:$0xff] }
 0x146   :  { %v211_v63 = vpack.c.bf16 %v210_v62, %v210_v62 }
 0x148   :  { %422 = vmatmul.mubr.bf16.vlgmr.msra.gmra.mrb[0].mxu0 %v211_v63  ;;  %957 = vmatmul.mubr.bf16.vlgmr.msra.gmra.mrb[8].mxu1 %v211_v63 }
 0x149   :  { %976 = vmatprep.mubr.msk.bf16.mxu0 %vm1236_vm1, %v1235_v6  ;;  %996 = vmatprep.mubr.msk.bf16.mxu1 %vm1236_vm1, %v1235_v6 }
 0x14a   :  { %961 = vmatpush3.bf16.msra.mxu0 %v1068_v0  ;;  %981 = vmatpush3.bf16.msra.mxu1 %v1076_v9 }
 0x14b   :  { %962 = vmatprep.subr.bf16.mxu0 %v1235_v6  ;;  %982 = vmatprep.subr.bf16.mxu1 %v1235_v6 }
 0x14e   :  { %963 = vmatpush3.bf16.msra.mxu0 %v1069_v1  ;;  %983 = vmatpush3.bf16.msra.mxu1 %v1077_v10 }
 0x14f   :  { %964 = vmatprep.subr.bf16.mxu0 %v1235_v6  ;;  %984 = vmatprep.subr.bf16.mxu1 %v1235_v6 }
 0x152   :  { %965 = vmatpush3.bf16.msra.mxu0 %v1070_v2  ;;  %985 = vmatpush3.bf16.msra.mxu1 %v1078_v11 }
 0x153   :  { %966 = vmatprep.subr.bf16.mxu0 %v1235_v6  ;;  %986 = vmatprep.subr.bf16.mxu1 %v1235_v6 }
 0x156   :  { %967 = vmatpush3.bf16.msra.mxu0 %v1071_v3  ;;  %987 = vmatpush3.bf16.msra.mxu1 %v1079_v12 }
 0x157   :  { %968 = vmatprep.subr.bf16.mxu0 %v1235_v6  ;;  %988 = vmatprep.subr.bf16.mxu1 %v1235_v6 }
 0x15a   :  { %969 = vmatpush3.bf16.msra.mxu0 %v1072_v4  ;;  %989 = vmatpush3.bf16.msra.mxu1 %v1080_v13 }
 0x15b   :  { %970 = vmatprep.subr.bf16.mxu0 %v1235_v6  ;;  %990 = vmatprep.subr.bf16.mxu1 %v1235_v6 }
 0x15e   :  { %971 = vmatpush3.bf16.msra.mxu0 %v1073_v5  ;;  %991 = vmatpush3.bf16.msra.mxu1 %v1081_v14  ;;  %v887_v5 = vld [vmem:[%s1413_s4 + $0x8] ss:$0 sm:$0xff] }
 0x15f   :  { %972 = vmatprep.subr.bf16.mxu0 %v1235_v6  ;;  %992 = vmatprep.subr.bf16.mxu1 %v1235_v6 }
 0x162   :  { %973 = vmatpush3.bf16.msra.mxu0 %v1074_v7  ;;  %993 = vmatpush3.bf16.msra.mxu1 %v1082_v43 }
 0x163   :  { %974 = vmatprep.subr.bf16.mxu0 %v1235_v6  ;;  %994 = vmatprep.subr.bf16.mxu1 %v1235_v6 }
 0x166   :  { %975 = vmatpush3.bf16.msra.mxu0 %v1075_v8  ;;  %995 = vmatpush3.bf16.msra.mxu1 %v1083_v44 }
 0x167   :  { %1000 = vmatprep.subr.bf16.mxu0 %v1235_v6 }
 0x21b   :  { %v423_v17 = vpop.f32.mrb[0].mxu0  ;;  %v464_v18 = vpop.f32.mrb[8].mxu1 }
 0x21c   :  { %v424_v19 = vadd.f32 %v423_v17, %v249_v16  ;;  %v425_v21 = vpop.f32.mrb[1].mxu0  ;;  %v958_v22 = vpop.f32.mrb[9].mxu1  ;;  %v465_v30 = vadd.f32 %v464_v18, %v257_v23 }
 0x21d   :  { %v427_v24 = vpop.f32.mrb[2].mxu0  ;;  %v467_v25 = vpop.f32.mrb[10].mxu1  ;;  %v426_v29 = vadd.f32 %v425_v21, %v253_v20 }
 0x21e   :  { %v470_v26 = vmul.f32 0.5, %v424_v19  ;;  %v428_v27 = vpop.f32.mrb[3].mxu0  ;;  %v959_v28 = vpop.f32.mrb[11].mxu1  ;;  %v475_v31 = vmul.f32 0.5, %v465_v30 }
 0x220   :  { %1100 = vtanh.f32 %v470_v26 }
 0x221   :  { %1102 = vtanh.f32 %v426_v29 }
 0x222   :  { %1104 = vtanh.f32 %v475_v31 }
 0x22a   :  { %v1101_v33 = vpop.eup %1100 }
 0x22b   :  { %v472_v34 = vmul.f32 0.5, %v1101_v33  ;;  %v1103_v36 = vpop.eup %1102 }
 0x22c   :  { %v1105_v38 = vpop.eup %1104 }
 0x22d   :  { %v473_v35 = vadd.f32 0.5, %v472_v34  ;;  %v477_v32 = vmul.f32 0.5, %v1105_v38 }
 0x22f   :  { %v479_v37 = vmul.f32 %v1103_v36, %v473_v35  ;;  %v478_v39 = vadd.f32 0.5, %v477_v32 }
 0x231   :  { %1106 = vtanh.f32 %v479_v37 }
 0x23b   :  { %v1107_v40 = vpop.eup %1106 }
 0x23c   :  { %v481_v41 = vmul.f32 %v1107_v40, %v478_v39 }
 0x23e   :  { %v482_v42 = vpack.c.bf16 %v481_v41, %v481_v41 }
 0x240   :  { %977 = vmatmul.mubr.bf16.vlgmr.msra.gmra.mrb[4].mxu0 %v482_v42 }
 0x241   :  { %1016 = vmatprep.mubr.msk.bf16.mxu0 %vm1236_vm1, %v1235_v6  ;;  %1001 = vmatpush3.bf16.msra.mxu0 %v1084_v45 }
 0x242   :  { %1002 = vmatprep.subr.bf16.mxu0 %v1235_v6 }
 0x245   :  { %1003 = vmatpush3.bf16.msra.mxu0 %v1085_v46 }
 0x246   :  { %1004 = vmatprep.subr.bf16.mxu0 %v1235_v6 }
 0x249   :  { %1005 = vmatpush3.bf16.msra.mxu0 %v1086_v47 }
 0x24a   :  { %1006 = vmatprep.subr.bf16.mxu0 %v1235_v6 }
 0x24d   :  { %1007 = vmatpush3.bf16.msra.mxu0 %v1087_v48 }
 0x24e   :  { %1008 = vmatprep.subr.bf16.mxu0 %v1235_v6 }
 0x251   :  { %1009 = vmatpush3.bf16.msra.mxu0 %v1088_v49 }
 0x252   :  { %1010 = vmatprep.subr.bf16.mxu0 %v1235_v6 }
 0x255   :  { %1011 = vmatpush3.bf16.msra.mxu0 %v1089_v50 }
 0x256   :  { %1012 = vmatprep.subr.bf16.mxu0 %v1235_v6 }
 0x259   :  { %1013 = vmatpush3.bf16.msra.mxu0 %v1090_v59 }
 0x25a   :  { %1014 = vmatprep.subr.bf16.mxu0 %v1235_v6 }
 0x25d   :  { %1015 = vmatpush3.bf16.msra.mxu0 %v1091_v60 }
 0x313   :  { %v588_v52 = vpop.f32.mrb[4].mxu0 }
 0x314   :  { %v589_v53 = vadd.f32 %v869_v51, %v588_v52  ;;  %v978_v54 = vpop.f32.mrb[5].mxu0 }
 0x315   :  { %v591_v55 = vpop.f32.mrb[6].mxu0 }
 0x316   :  { %v594_v56 = vmax.f32 %v589_v53, 0.0  ;;  %v979_v57 = vpop.f32.mrb[7].mxu0 }
 0x318   :  { %v595_v58 = vpack.c.bf16 %v594_v56, %v594_v56 }
 0x31a   :  { %997 = vmatmul.mubr.bf16.vlgmr.msra.gmra.mrb[12].mxu1 %v595_v58 }
 0x3ed   :  { %v702_v62 = vpop.f32.mrb[12].mxu1 }
 0x3ee   :  { %v703_v63 = vadd.f32 %v878_v61, %v702_v62  ;;  %v998_v0 = vpop.f32.mrb[13].mxu1 }
 0x3ef   :  { %v705_v1 = vpop.f32.mrb[14].mxu1 }
 0x3f0   :  { %v708_v2 = vmax.f32 %v703_v63, 0.0  ;;  %v999_v3 = vpop.f32.mrb[15].mxu1 }
 0x3f2   :  { %v709_v4 = vpack.c.bf16 %v708_v2, %v708_v2 }
 0x3f4   :  { %1017 = vmatmul.mubr.bf16.vlgmr.msra.gmra.mrb[8].mxu0 %v709_v4 }
 0x4c7   :  { %v816_v6 = vpop.f32.mrb[8].mxu0 }
 0x4c8   :  { %v817_v7 = vadd.f32 %v887_v5, %v816_v6  ;;  %v1018_v8 = vpop.f32.mrb[9].mxu0 }
 0x4c9   :  { %v819_v9 = vpop.f32.mrb[10].mxu0 }
 0x4ca   :  { %822 = vst [vmem:[#allocation10] sm:$0xff] %v817_v7  ;;  %v1019_v10 = vpop.f32.mrb[11].mxu0 }
 0x4cb   :  { %1207 = shalt.err (!%p1204_p8)
}
 0x4cc   :  { %s1208_s4 = scalar_lea.hbm %s1414_s5, 128 }
 0x4cd   :  { %p1209_p9 = scmp.ne.s32.totalorder %s1414_s5, %s1208_s4  ;;  %p1212_p10 = scmp.lt.u32.totalorder %s1208_s4, %s1414_s5 }
 0x4cf   :  { %p1214_p11 = pnand %p1212_p10, %p1209_p9 }
 0x4d1   :  { %1217 = shalt.err (!%p1214_p11)
}
 0x4d2   :  { %832 = dma.vmem_to_hbm [thread:$0]  %s830_s26, 128, %s1414_s5, [#allocation4]  }
 0x4d3   :  { %1224 = dma.done.wait [#allocation4], 128  }
 0x4d4   :  { %1225 = vsyncadd [#allocation4], 4294967168 }
 0x4d5   :  { %836 = vsyncpa [#allocation3], 1 }
 0x4d6   :  { %837 = vsyncpa [#allocation6], 1 }
 0x4d7   :  { %838 = vsyncpa [#allocation9], 1 }
 0x4d8   :  { %839 = vsyncpa [#allocation4], 1 }

</bundles_post_ra>
